<compile_context>
chip_gen: v7x
topology: tpu7x:2x2x1
jax: 0.10.0
libtpu: 0.0.40
codegen_flags: <defaults>
</compile_context>

<pallas_src>
import jax
import jax.numpy as jnp
from jax.experimental import pallas as pl
from jax.experimental.pallas import tpu as pltpu


def _round_up(x, m):
    return ((x + m - 1) // m) * m


def actor_kernel(s_ref, w1_ref, b1_ref, w2_ref, b2_ref, w3_ref, b3_ref, out_ref):
    # Cast activations to the weight dtype right before each matmul (f32 MXU
    # accumulation); bias add / ReLU / clamp stay in f32 on the VPU.
    x = s_ref[...].astype(w1_ref.dtype)                               # (TB, S)

    h1 = jnp.dot(x, w1_ref[...],
                 preferred_element_type=jnp.float32) + b1_ref[...]
    h1 = jnp.maximum(h1, 0.0)

    h2 = jnp.dot(h1.astype(w2_ref.dtype), w2_ref[...],
                 preferred_element_type=jnp.float32) + b2_ref[...]
    h2 = jnp.maximum(h2, 0.0)

    out = jnp.dot(h2.astype(w3_ref.dtype), w3_ref[...],
                  preferred_element_type=jnp.float32) + b3_ref[...]   # (TB, 2A)

    # chunk(2, dim=-1): clamp the log_std half with a lane mask so we do
    # exactly ONE lane-dense store; the actual split happens in the wrapper.
    action_dim = out_ref.shape[-1] // 2
    col = jax.lax.broadcasted_iota(jnp.int32, out.shape, dimension=1)
    out = jnp.where(col >= action_dim, jnp.clip(out, -20.0, 2.0), out)
    out_ref[...] = out.astype(out_ref.dtype)


def _choose_tile(batch, tile_b, min_steps):
    """Pick a sublane-aligned batch tile.

    Small batches: single tile (block dim == full array dim, always legal).
    Large batches: split into >= `min_steps` tiles (so both v7x TensorCores get
    work), capped at `tile_b` rows so the live VMEM stays small on every
    generation.
    """
    if batch <= max(16, 2 * min_steps * 8):
        return batch
    target = _round_up(pl.cdiv(batch, min_steps), 8)
    return max(8, min(_round_up(tile_b, 8), target))


def actor_forward(state, params, *, tile_b=4096, min_steps=2,
                  out_dtype=jnp.float32):
    """Fused Pallas forward of the SAC Actor.  Returns (mean, log_std).

    The MXU matmul dtype follows the weight dtype (cast weights once with
    `cast_actor_weights` for bf16); `state` is consumed as-is (f32) and cast
    inside the kernel, so there are no wrapper-side cast/pad/slice HBM passes.
    """
    w1, b1, w2, b2, w3, b3 = params
    batch, state_dim = state.shape
    hidden = w1.shape[1]
    out_dim = w3.shape[1]               # 2 * action_dim
    action_dim = out_dim // 2

    tile = _choose_tile(batch, tile_b, min_steps)
    grid = (pl.cdiv(batch, tile),)      # ragged last tile: OOB writes dropped

    out = pl.pallas_call(
        actor_kernel,
        out_shape=jax.ShapeDtypeStruct((batch, out_dim), out_dtype),
        grid=grid,
        in_specs=[
            # streamed activation tile (f32 straight from HBM)
            pl.BlockSpec((tile, state_dim), lambda i: (i, 0)),
            # resident weights / biases (constant index_map -> no re-DMA)
            pl.BlockSpec((state_dim, hidden), lambda i: (0, 0)),
            pl.BlockSpec((1, hidden), lambda i: (0, 0)),
            pl.BlockSpec((hidden, hidden), lambda i: (0, 0)),
            pl.BlockSpec((1, hidden), lambda i: (0, 0)),
            pl.BlockSpec((hidden, out_dim), lambda i: (0, 0)),
            pl.BlockSpec((1, out_dim), lambda i: (0, 0)),
        ],
        out_specs=pl.BlockSpec((tile, out_dim), lambda i: (i, 0)),
        compiler_params=pltpu.CompilerParams(
            dimension_semantics=("parallel",),   # batch axis: megacore-shardable
        ),
    )(state, w1, b1, w2, b2, w3, b3)

    mean = out[:, :action_dim]
    log_std = out[:, action_dim:]
    return mean, log_std


def cast_actor_weights(params, dtype=jnp.bfloat16):
    """One-time (outside the hot path) cast of the weight matrices for the MXU.

    Biases stay in f32 since the bias add / ReLU / clamp run in f32 on the VPU.
    """
    w1, b1, w2, b2, w3, b3 = params
    return (w1.astype(dtype), b1, w2.astype(dtype), b2, w3.astype(dtype), b3)


def init_actor_params(key, state_dim, action_dim, hidden_dim=128):
    """Deterministic init mimicking torch.nn.Linear default (U(-1/sqrt(fan_in), +))."""
    ks = jax.random.split(key, 6)

    def linear(kw, kb, fan_in, fan_out):
        bound = 1.0 / jnp.sqrt(jnp.float32(fan_in))
        w = jax.random.uniform(kw, (fan_in, fan_out), jnp.float32, -bound, bound)
        b = jax.random.uniform(kb, (1, fan_out), jnp.float32, -bound, bound)
        return w, b

    w1, b1 = linear(ks[0], ks[1], state_dim, hidden_dim)
    w2, b2 = linear(ks[2], ks[3], hidden_dim, hidden_dim)
    w3, b3 = linear(ks[4], ks[5], hidden_dim, action_dim * 2)
    return (w1, b1, w2, b2, w3, b3)


def actor_forward_ref(state, params):
    """Pure-JAX reference of the PyTorch Actor.forward for verification."""
    w1, b1, w2, b2, w3, b3 = params
    h1 = jnp.maximum(state @ w1 + b1, 0.0)
    h2 = jnp.maximum(h1 @ w2 + b2, 0.0)
    out = h2 @ w3 + b3
    action_dim = w3.shape[1] // 2
    mean = out[:, :action_dim]
    log_std = jnp.clip(out[:, action_dim:], -20.0, 2.0)
    return mean, log_std


if __name__ == "__main__":
    state_dim, action_dim, hidden_dim = 16, 4, 128

    key = jax.random.PRNGKey(0)
    k_params, k_s1, k_s2, k_s3 = jax.random.split(key, 4)
    params = init_actor_params(k_params, state_dim, action_dim, hidden_dim)
    params_bf16 = cast_actor_weights(params)      # one-time cast, not per call

    # --- tiny batch, exact f32 path, single tile ---
    batch = 4
    state = jax.random.normal(k_s1, (batch, state_dim), jnp.float32)
    mean, log_std = actor_forward(state, params)
    jax.block_until_ready((mean, log_std))
    mean_ref, log_std_ref = actor_forward_ref(state, params)
    assert mean.shape == (batch, action_dim)
    assert log_std.shape == (batch, action_dim)
    assert jnp.allclose(mean, mean_ref, atol=1e-5, rtol=1e-5)
    assert jnp.allclose(log_std, log_std_ref, atol=1e-5, rtol=1e-5)

    # --- larger batch, bf16 MXU operands, 2 grid steps (v7x megacore path) ---
    batch_big = 512
    state_big = jax.random.normal(k_s2, (batch_big, state_dim), jnp.float32)
    mean_b, log_std_b = actor_forward(state_big, params_bf16)
    jax.block_until_ready((mean_b, log_std_b))
    mean_b_ref, log_std_b_ref = actor_forward_ref(state_big, params)
    assert mean_b.shape == (batch_big, action_dim)
    assert log_std_b.shape == (batch_big, action_dim)
    assert jnp.allclose(mean_b, mean_b_ref, atol=5e-2, rtol=5e-2)
    assert jnp.allclose(log_std_b, log_std_b_ref, atol=5e-2, rtol=5e-2)

    # --- ragged batch (not a multiple of the tile), f32, cdiv grid ---
    batch_r = 300
    state_r = jax.random.normal(k_s3, (batch_r, state_dim), jnp.float32)
    mean_r, log_std_r = actor_forward(state_r, params)
    jax.block_until_ready((mean_r, log_std_r))
    mean_r_ref, log_std_r_ref = actor_forward_ref(state_r, params)
    assert mean_r.shape == (batch_r, action_dim)
    assert jnp.allclose(mean_r, mean_r_ref, atol=1e-5, rtol=1e-5)
    assert jnp.allclose(log_std_r, log_std_r_ref, atol=1e-5, rtol=1e-5)

    print("KERNEL_OK")
</pallas_src>

<mosaic_0001>
module attributes {stable_mosaic.version = 11 : i64} {
  func.func @actor_kernel(%arg0: i32, %arg1: memref<4x16xf32, #tpu.memory_space<vmem>>, %arg2: memref<16x128xf32, #tpu.memory_space<vmem>>, %arg3: memref<1x128xf32, #tpu.memory_space<vmem>>, %arg4: memref<128x128xf32, #tpu.memory_space<vmem>>, %arg5: memref<1x128xf32, #tpu.memory_space<vmem>>, %arg6: memref<128x8xf32, #tpu.memory_space<vmem>>, %arg7: memref<1x8xf32, #tpu.memory_space<vmem>>, %arg8: memref<4x8xf32, #tpu.memory_space<vmem>>) attributes {dimension_semantics = [#tpu.dimension_semantics<parallel>], iteration_bounds = array<i64: 1>, scalar_prefetch = 0 : i64, scratch_operands = 0 : i64, tpu.core_type = #tpu.core_type<tc>, window_params = [{transform_indices = @transform_0, window_bounds = array<i64: 4, 16>}, {pipeline_mode = #tpu.pipeline_mode<synchronous>, transform_indices = @transform_1, window_bounds = array<i64: 16, 128>}, {pipeline_mode = #tpu.pipeline_mode<synchronous>, transform_indices = @transform_2, window_bounds = array<i64: 1, 128>}, {pipeline_mode = #tpu.pipeline_mode<synchronous>, transform_indices = @transform_3, window_bounds = array<i64: 128, 128>}, {pipeline_mode = #tpu.pipeline_mode<synchronous>, transform_indices = @transform_4, window_bounds = array<i64: 1, 128>}, {pipeline_mode = #tpu.pipeline_mode<synchronous>, transform_indices = @transform_5, window_bounds = array<i64: 128, 8>}, {pipeline_mode = #tpu.pipeline_mode<synchronous>, transform_indices = @transform_6, window_bounds = array<i64: 1, 8>}, {transform_indices = @transform_7, window_bounds = array<i64: 4, 8>}]} {
    %c0 = arith.constant 0 : index
    %c0_0 = arith.constant 0 : index
    %0 = vector.load %arg1[%c0, %c0_0] : memref<4x16xf32, #tpu.memory_space<vmem>>, vector<4x16xf32>
    %c0_1 = arith.constant 0 : index
    %c0_2 = arith.constant 0 : index
    %1 = vector.load %arg2[%c0_1, %c0_2] : memref<16x128xf32, #tpu.memory_space<vmem>>, vector<16x128xf32>
    %cst = arith.constant dense<0.000000e+00> : vector<4x128xf32>
    %2 = tpu.matmul %0, %1, %cst {dimension_numbers = #tpu.dot_dimension_numbers<[1], [0], [0], [1], [0, 0, 1, 1], [], []>} : vector<4x16xf32>, vector<16x128xf32>, vector<4x128xf32> -> vector<4x128xf32>
    %c0_3 = arith.constant 0 : index
    %c0_4 = arith.constant 0 : index
    %3 = vector.load %arg3[%c0_3, %c0_4] : memref<1x128xf32, #tpu.memory_space<vmem>>, vector<1x128xf32>
    %4 = vector.broadcast %3 : vector<1x128xf32> to vector<4x128xf32>
    %5 = arith.addf %2, %4 : vector<4x128xf32>
    %cst_5 = arith.constant 0.000000e+00 : f32
    %6 = vector.broadcast %cst_5 : f32 to vector<4x128xf32>
    %7 = arith.maximumf %5, %6 : vector<4x128xf32>
    %c0_6 = arith.constant 0 : index
    %c0_7 = arith.constant 0 : index
    %8 = vector.load %arg4[%c0_6, %c0_7] : memref<128x128xf32, #tpu.memory_space<vmem>>, vector<128x128xf32>
    %cst_8 = arith.constant dense<0.000000e+00> : vector<4x128xf32>
    %9 = tpu.matmul %7, %8, %cst_8 {dimension_numbers = #tpu.dot_dimension_numbers<[1], [0], [0], [1], [0, 0, 1, 1], [], []>} : vector<4x128xf32>, vector<128x128xf32>, vector<4x128xf32> -> vector<4x128xf32>
    %c0_9 = arith.constant 0 : index
    %c0_10 = arith.constant 0 : index
    %10 = vector.load %arg5[%c0_9, %c0_10] : memref<1x128xf32, #tpu.memory_space<vmem>>, vector<1x128xf32>
    %11 = vector.broadcast %10 : vector<1x128xf32> to vector<4x128xf32>
    %12 = arith.addf %9, %11 : vector<4x128xf32>
    %cst_11 = arith.constant 0.000000e+00 : f32
    %13 = vector.broadcast %cst_11 : f32 to vector<4x128xf32>
    %14 = arith.maximumf %12, %13 : vector<4x128xf32>
    %c0_12 = arith.constant 0 : index
    %c0_13 = arith.constant 0 : index
    %15 = vector.load %arg6[%c0_12, %c0_13] : memref<128x8xf32, #tpu.memory_space<vmem>>, vector<128x8xf32>
    %cst_14 = arith.constant dense<0.000000e+00> : vector<4x8xf32>
    %16 = tpu.matmul %14, %15, %cst_14 {dimension_numbers = #tpu.dot_dimension_numbers<[1], [0], [0], [1], [0, 0, 1, 1], [], []>} : vector<4x128xf32>, vector<128x8xf32>, vector<4x8xf32> -> vector<4x8xf32>
    %c0_15 = arith.constant 0 : index
    %c0_16 = arith.constant 0 : index
    %17 = vector.load %arg7[%c0_15, %c0_16] : memref<1x8xf32, #tpu.memory_space<vmem>>, vector<1x8xf32>
    %18 = vector.broadcast %17 : vector<1x8xf32> to vector<4x8xf32>
    %19 = arith.addf %16, %18 : vector<4x8xf32>
    %20 = tpu.iota {dimensions = array<i32: 1>} : vector<4x8xi32>
    %c4_i32 = arith.constant 4 : i32
    %21 = vector.broadcast %c4_i32 : i32 to vector<4x8xi32>
    %22 = arith.cmpi sge, %20, %21 : vector<4x8xi32>
    %cst_17 = arith.constant -2.000000e+01 : f32
    %cst_18 = arith.constant 2.000000e+00 : f32
    %23 = vector.broadcast %cst_17 : f32 to vector<4x8xf32>
    %24 = arith.maximumf %23, %19 : vector<4x8xf32>
    %25 = vector.broadcast %cst_18 : f32 to vector<4x8xf32>
    %26 = arith.minimumf %25, %24 : vector<4x8xf32>
    %27 = arith.select %22, %26, %19 : vector<4x8xi1>, vector<4x8xf32>
    %c0_19 = arith.constant 0 : index
    %c0_20 = arith.constant 0 : index
    %28 = vector.load %arg8[%c0_19, %c0_20] : memref<4x8xf32, #tpu.memory_space<vmem>>, vector<4x8xf32>
    tpu.vector_store %arg8[%c0_19, %c0_20], %27 {strides = array<i32>} : memref<4x8xf32, #tpu.memory_space<vmem>>, vector<4x8xf32>,
    return
  }
  func.func @transform_0(%arg0: i32) -> (i32, i32) {
    %c0_i32 = arith.constant 0 : i32
    %c0_i32_0 = arith.constant 0 : i32
    return %arg0, %c0_i32 : i32, i32
  }
  func.func @transform_1(%arg0: i32) -> (i32, i32) {
    %c0_i32 = arith.constant 0 : i32
    %c0_i32_0 = arith.constant 0 : i32
    %c0_i32_1 = arith.constant 0 : i32
    return %c0_i32, %c0_i32_0 : i32, i32
  }
  func.func @transform_2(%arg0: i32) -> (i32, i32) {
    %c0_i32 = arith.constant 0 : i32
    %c0_i32_0 = arith.constant 0 : i32
    %c0_i32_1 = arith.constant 0 : i32
    return %c0_i32, %c0_i32_0 : i32, i32
  }
  func.func @transform_3(%arg0: i32) -> (i32, i32) {
    %c0_i32 = arith.constant 0 : i32
    %c0_i32_0 = arith.constant 0 : i32
    %c0_i32_1 = arith.constant 0 : i32
    return %c0_i32, %c0_i32_0 : i32, i32
  }
  func.func @transform_4(%arg0: i32) -> (i32, i32) {
    %c0_i32 = arith.constant 0 : i32
    %c0_i32_0 = arith.constant 0 : i32
    %c0_i32_1 = arith.constant 0 : i32
    return %c0_i32, %c0_i32_0 : i32, i32
  }
  func.func @transform_5(%arg0: i32) -> (i32, i32) {
    %c0_i32 = arith.constant 0 : i32
    %c0_i32_0 = arith.constant 0 : i32
    %c0_i32_1 = arith.constant 0 : i32
    return %c0_i32, %c0_i32_0 : i32, i32
  }
  func.func @transform_6(%arg0: i32) -> (i32, i32) {
    %c0_i32 = arith.constant 0 : i32
    %c0_i32_0 = arith.constant 0 : i32
    %c0_i32_1 = arith.constant 0 : i32
    return %c0_i32, %c0_i32_0 : i32, i32
  }
  func.func @transform_7(%arg0: i32) -> (i32, i32) {
    %c0_i32 = arith.constant 0 : i32
    %c0_i32_0 = arith.constant 0 : i32
    return %arg0, %c0_i32 : i32, i32
  }
}

</mosaic_0001>

<bundles_post_ra>
// kernel: tpu_custom_call.1
= control target key start
LH: loop header
LB: loop body
LE: loop exit
PB: predicated region body
PF: predicated region fallthrough
CT: control target
= control target key end

     0   :  { %12 = vsyncpa [#allocation3], 0  ;;  %s756_s0 = inlined_call_operand.hbm [shape: f32[4,16], index: 0, kind: input, shape index: {}]   ;;  %s757_s1 = inlined_call_operand.vmem [shape: f32[16,128], index: 1, kind: input, shape index: {}]   ;;  %s758_s2 = inlined_call_operand.vmem [shape: f32[1,128], index: 2, kind: input, shape index: {}]   ;;  %s759_s3 = inlined_call_operand.vmem [shape: f32[128,128], index: 3, kind: input, shape index: {}]   ;;  %s760_s4 = inlined_call_operand.vmem [shape: f32[1,128], index: 4, kind: input, shape index: {}]   ;;  %s761_s5 = inlined_call_operand.vmem [shape: f32[128,8], index: 5, kind: input, shape index: {}]   ;;  %s762_s6 = inlined_call_operand.vmem [shape: f32[1,8], index: 6, kind: input, shape index: {}]   ;;  %s763_s7 = inlined_call_operand.hbm [shape: f32[4,8], index: 7, kind: output, shape index: {}]  }
   0x1   :  { %13 = vsyncpa [#allocation4], 0  ;;  %s556_s24 = smov [#allocation2]   ;;  %s508_s28 = scalar_lea.hbm %s756_s0, 64 }
   0x2   :  { %s20_s25 = sshll.u32 %s556_s24, 4  ;;  %p509_p0 = scmp.ne.s32.totalorder %s756_s0, %s508_s28  ;;  %s21_s25 = int_to_ptr.vmem [resolvable:$true] %s20_s25 }
   0x3   :  { %p512_p1 = scmp.lt.u32.totalorder %s508_s28, %s756_s0 }
   0x5   :  { %p514_p2 = pnand %p512_p1, %p509_p0 }
   0x7   :  { %517 = shalt.err (!%p514_p2)
}
   0x8   :  { %s518_s10 = scalar_lea.vmem %s21_s25, 64  ;;  %p523_p4 = scmp.lt.s32.totalorder %s21_s25, %s21_s25 }
   0x9   :  { %p519_p3 = scmp.ne.s32.totalorder %s21_s25, %s518_s10  ;;  %p524_p5 = scmp.lt.s32.totalorder %s518_s10, %s518_s10 }
   0xb   :  { %p525_p6 = por %p524_p5, %p523_p4 }
   0xd   :  { %p526_p7 = pnand %p525_p6, %p519_p3 }
   0xf   :  { %529 = shalt.err (!%p526_p7)
}
  0x10   :  { %23 = dma.hbm_to_vmem [thread:$0]  %s756_s0, 64, %s21_s25, [#allocation3]  }
  0x11   :  { %552 = dma.done.wait [#allocation3], 64  }
  0x12   :  { %553 = vsyncadd [#allocation3], 4294967232  ;;  %v557_v0 = vmov 0.0|0.0   ;;  %vm558_vm0 = vmmov 0   ;;  %v559_v1 = vmov 0.0   ;;  %v40_v2 = vld [vmem:[%s757_s1] sm:$0xff] }
  0x13   :  { %452 = vmatprep.subr.bf16.mxu0 %v557_v0  ;;  %379 = vmatprep.mubr.msk.f32.mxu0 %vm558_vm0, %v559_v1  ;;  %v41_v3 = vld [vmem:[%s757_s1 + $0x8] sm:$0xff]  ;;  %v124_v5 = vld [vmem:[%s759_s3] sm:$0xff]  ;;  %v126_v7 = vld [vmem:[%s759_s3 + $0x10] sm:$0xff]  ;;  %vm49_vm1 = vcmask 130048   ;;  %vm317_vm3 = vcmask 60416  }
  0x14   :  { %455 = vmatprep.subr.bf16.mxu1 %v557_v0  ;;  %414 = vmatprep.mubr.msk.f32.mxu1 %vm558_vm0, %v559_v1  ;;  %v453_v4 = vpack.c.bf16 %v41_v3, %v40_v2  ;;  %v125_v6 = vld [vmem:[%s759_s3 + $0x8] sm:$0xff]  ;;  %v127_v9 = vld [vmem:[%s759_s3 + $0x18] sm:$0xff]  ;;  %v39_v10 = vld [vmem:[#allocation2] sm:$0xf] }
  0x15   :  { %v456_v8 = vpack.c.bf16 %v125_v6, %v124_v5  ;;  %v459_v11 = vpack.c.bf16 %v127_v9, %v126_v7  ;;  %v128_v12 = vld [vmem:[%s759_s3 + $0x20] sm:$0xff]  ;;  %v129_v13 = vld [vmem:[%s759_s3 + $0x28] sm:$0xff]  ;;  %v130_v15 = vld [vmem:[%s759_s3 + $0x30] sm:$0xff] }
  0x16   :  { %454 = vmatpush3.bf16.msra.mxu0 %v453_v4  ;;  %v462_v14 = vpack.c.bf16 %v129_v13, %v128_v12  ;;  %v131_v16 = vld [vmem:[%s759_s3 + $0x38] sm:$0xff]  ;;  %v132_v18 = vld [vmem:[%s759_s3 + $0x40] sm:$0xff]  ;;  %v133_v19 = vld [vmem:[%s759_s3 + $0x48] sm:$0xff] }
  0x17   :  { %457 = vmatpush3.bf16.msra.mxu1 %v456_v8  ;;  %479 = vmatprep.subr.bf16.mxu0 %v557_v0  ;;  %v465_v17 = vpack.c.bf16 %v131_v16, %v130_v15  ;;  %v468_v20 = vpack.c.bf16 %v133_v19, %v132_v18  ;;  %v134_v21 = vld [vmem:[%s759_s3 + $0x50] sm:$0xff]  ;;  %v135_v22 = vld [vmem:[%s759_s3 + $0x58] sm:$0xff]  ;;  %v136_v24 = vld [vmem:[%s759_s3 + $0x60] sm:$0xff] }
  0x18   :  { %458 = vmatprep.subr.bf16.mxu1 %v557_v0  ;;  %v471_v23 = vpack.c.bf16 %v135_v22, %v134_v21  ;;  %v137_v25 = vld [vmem:[%s759_s3 + $0x68] sm:$0xff]  ;;  %v138_v27 = vld [vmem:[%s759_s3 + $0x70] sm:$0xff]  ;;  %v139_v28 = vld [vmem:[%s759_s3 + $0x78] sm:$0xff] }
  0x19   :  { %380 = vmatmul.mubr.msk.f32.vlgmr.msra.gmra.mrb[0].mxu0 %vm49_vm1, %v39_v10  ;;  %v474_v26 = vpack.c.bf16 %v137_v25, %v136_v24  ;;  %v477_v29 = vpack.c.bf16 %v139_v28, %v138_v27  ;;  %v218_v30 = vld [vmem:[%s761_s5] sm:$0xff]  ;;  %v219_v31 = vld [vmem:[%s761_s5 + $0x8] sm:$0xff]  ;;  %v220_v32 = vld [vmem:[%s761_s5 + $0x10] sm:$0xff] }
  0x1a   :  { %449 = vmatprep.mubr.msk.f32.mxu0 %vm558_vm0, %v559_v1  ;;  %v480_v33 = vpack.c.bf16 %v219_v31, %v218_v30  ;;  %v221_v34 = vld [vmem:[%s761_s5 + $0x18] sm:$0xff]  ;;  %v222_v36 = vld [vmem:[%s761_s5 + $0x20] sm:$0xff]  ;;  %v223_v37 = vld [vmem:[%s761_s5 + $0x28] sm:$0xff] }
  0x1b   :  { %460 = vmatpush3.bf16.msra.mxu1 %v459_v11  ;;  %v483_v35 = vpack.c.bf16 %v221_v34, %v220_v32  ;;  %v486_v38 = vpack.c.bf16 %v223_v37, %v222_v36  ;;  %v224_v39 = vld [vmem:[%s761_s5 + $0x30] sm:$0xff]  ;;  %v225_v40 = vld [vmem:[%s761_s5 + $0x38] sm:$0xff]  ;;  %v226_v42 = vld [vmem:[%s761_s5 + $0x40] sm:$0xff] }
  0x1c   :  { %461 = vmatprep.subr.bf16.mxu1 %v557_v0  ;;  %481 = vmatpush3.bf16.msra.mxu0 %v480_v33  ;;  %v489_v41 = vpack.c.bf16 %v225_v40, %v224_v39  ;;  %v227_v43 = vld [vmem:[%s761_s5 + $0x48] sm:$0xff]  ;;  %v228_v45 = vld [vmem:[%s761_s5 + $0x50] sm:$0xff]  ;;  %v229_v46 = vld [vmem:[%s761_s5 + $0x58] sm:$0xff] }
  0x1d   :  { %482 = vmatprep.subr.bf16.mxu0 %v557_v0  ;;  %v492_v44 = vpack.c.bf16 %v227_v43, %v226_v42  ;;  %v495_v47 = vpack.c.bf16 %v229_v46, %v228_v45  ;;  %v230_v48 = vld [vmem:[%s761_s5 + $0x60] sm:$0xff]  ;;  %v231_v49 = vld [vmem:[%s761_s5 + $0x68] sm:$0xff]  ;;  %v232_v56 = vld [vmem:[%s761_s5 + $0x70] sm:$0xff] }
  0x1e   :  { %v498_v50 = vpack.c.bf16 %v231_v49, %v230_v48  ;;  %v334_v51 = vld [vmem:[%s758_s2] ss:$0 sm:$0xff]  ;;  %v233_v57 = vld [vmem:[%s761_s5 + $0x78] sm:$0xff]  ;;  %s560_s5 = smov [#allocation5]  }
  0x1f   :  { %463 = vmatpush3.bf16.msra.mxu1 %v462_v14  ;;  %v501_v58 = vpack.c.bf16 %v233_v57, %v232_v56  ;;  %v336_v59 = vld [vmem:[%s760_s4] ss:$0 sm:$0xff]  ;;  %s325_s9 = sshll.u32 %s560_s5, 4  ;;  %s326_s9 = int_to_ptr.vmem [resolvable:$true] %s325_s9 }
  0x20   :  { %464 = vmatprep.subr.bf16.mxu1 %v557_v0  ;;  %484 = vmatpush3.bf16.msra.mxu0 %v483_v35  ;;  %v337_v1 = vld [vmem:[%s762_s6] ss:$0 sm:$0xff]  ;;  %s530_s4 = scalar_lea.vmem %s326_s9, 64  ;;  %p535_p9 = scmp.lt.s32.totalorder %s326_s9, %s326_s9 }
  0x21   :  { %485 = vmatprep.subr.bf16.mxu0 %v557_v0  ;;  %p531_p8 = scmp.ne.s32.totalorder %s326_s9, %s530_s4  ;;  %p536_p10 = scmp.lt.s32.totalorder %s530_s4, %s530_s4 }
  0x23   :  { %466 = vmatpush3.bf16.msra.mxu1 %v465_v17  ;;  %p537_p11 = por %p536_p10, %p535_p9 }
  0x24   :  { %467 = vmatprep.subr.bf16.mxu1 %v557_v0  ;;  %487 = vmatpush3.bf16.msra.mxu0 %v486_v38 }
  0x25   :  { %488 = vmatprep.subr.bf16.mxu0 %v557_v0  ;;  %p538_p12 = pnand %p537_p11, %p531_p8 }
  0x27   :  { %469 = vmatpush3.bf16.msra.mxu1 %v468_v20 }
  0x28   :  { %470 = vmatprep.subr.bf16.mxu1 %v557_v0  ;;  %490 = vmatpush3.bf16.msra.mxu0 %v489_v41 }
  0x29   :  { %491 = vmatprep.subr.bf16.mxu0 %v557_v0 }
  0x2b   :  { %472 = vmatpush3.bf16.msra.mxu1 %v471_v23 }
  0x2c   :  { %473 = vmatprep.subr.bf16.mxu1 %v557_v0  ;;  %493 = vmatpush3.bf16.msra.mxu0 %v492_v44 }
  0x2d   :  { %494 = vmatprep.subr.bf16.mxu0 %v557_v0 }
  0x2f   :  { %475 = vmatpush3.bf16.msra.mxu1 %v474_v26 }
  0x30   :  { %476 = vmatprep.subr.bf16.mxu1 %v557_v0  ;;  %496 = vmatpush3.bf16.msra.mxu0 %v495_v47 }
  0x31   :  { %497 = vmatprep.subr.bf16.mxu0 %v557_v0 }
  0x33   :  { %478 = vmatpush3.bf16.msra.mxu1 %v477_v29 }
  0x34   :  { %499 = vmatpush3.bf16.msra.mxu0 %v498_v50 }
  0x35   :  { %500 = vmatprep.subr.bf16.mxu0 %v557_v0  ;;  %v311_v0 = vlaneseq }
  0x37   :  { %v312_v3 = vand.u32 127, %v311_v0 }
  0x38   :  { %502 = vmatpush3.bf16.msra.mxu0 %v501_v58 }
  0x39   :  { %vm313_vm2 = vcmp.ge.s32.totalorder %v312_v3, 4 }
  0xec   :  { %v119_v52 = vpop.f32.mrb[0].mxu0 }
  0xed   :  { %v120_v53 = vadd.f32 %v334_v51, %v119_v52  ;;  %v381_v54 = vpop.f32.mrb[1].mxu0 }
  0xef   :  { %v123_v55 = vmax.f32 %v120_v53, 0.0 }
  0xf1   :  { %415 = vmatmul.mubr.f32.vlgmr.msra.gmra.mrb[0].mxu1 %v123_v55 }
 0x1c4   :  { %v213_v60 = vpop.f32.mrb[0].mxu1 }
 0x1c5   :  { %v214_v61 = vadd.f32 %v336_v59, %v213_v60  ;;  %v416_v62 = vpop.f32.mrb[1].mxu1 }
 0x1c7   :  { %v217_v63 = vmax.f32 %v214_v61, 0.0 }
 0x1c9   :  { %450 = vmatmul.mubr.f32.vlgmr.msra.gmra.mrb[2].mxu0 %v217_v63 }
 0x29c   :  { %v307_v2 = vpop.f32.mrb[2].mxu0 }
 0x29d   :  { %v308_v4 = vadd.f32 %v337_v1, %v307_v2  ;;  %v451_v5 = vpop.f32.mrb[3].mxu0 }
 0x29f   :  { %v314_v6 = vmax.f32 %v308_v4, -20.0 }
 0x2a1   :  { %v315_v7 = vmin.f32 %v314_v6, 2.0 }
 0x2a3   :  { %v316_v8 = vsel %vm313_vm2, %v315_v7, %v308_v4 }
 0x2a4   :  { %318 = vst.msk [vmem:[#allocation5] sm:$0xf] %vm317_vm3, %v316_v8 }
 0x2a5   :  { %541 = shalt.err (!%p538_p12)
}
 0x2a6   :  { %s542_s11 = scalar_lea.hbm %s763_s7, 64 }
 0x2a7   :  { %p543_p13 = scmp.ne.s32.totalorder %s763_s7, %s542_s11  ;;  %p546_p0 = scmp.lt.u32.totalorder %s542_s11, %s763_s7 }
 0x2a9   :  { %p548_p1 = pnand %p546_p0, %p543_p13 }
 0x2ab   :  { %551 = shalt.err (!%p548_p1)
}
 0x2ac   :  { %328 = dma.vmem_to_hbm [thread:$0]  %s326_s9, 64, %s763_s7, [#allocation4]  }
 0x2ad   :  { %554 = dma.done.wait [#allocation4], 64  }
 0x2ae   :  { %555 = vsyncadd [#allocation4], 4294967232 }
 0x2af   :  { %332 = vsyncpa [#allocation3], 1 }
 0x2b0   :  { %333 = vsyncpa [#allocation4], 1 }

</bundles_post_ra>
